<compile_context>
chip_gen: v6e
topology: v6e:2x2x1
jax: 0.10.0
libtpu: 0.0.40
codegen_flags: <defaults>
</compile_context>

<pallas_src>
import functools

import jax
import jax.numpy as jnp
from jax.experimental import pallas as pl
from jax.experimental.pallas import tpu as pltpu


def _make_kernel(kh, kw, stride, th, ow, c2):
    """Shift-and-matmul conv for one (row-band, OC-tile) grid cell."""

    def kernel(x_ref, w_ref, b_ref, o_ref):
        # x_ref: (ROWS, WCOLS, 2C)  padded input band, [real | imag] channels
        # w_ref: (KH*KW, 2C, toc)   fused complex weights per kernel offset
        # b_ref: (1, toc)           fused bias [br - bi | br + bi] tile
        # o_ref: (TH*OW, toc)       output rows for this band
        xs = x_ref[...]
        acc = jnp.zeros(o_ref.shape, jnp.float32)
        for ki in range(kh):
            for kj in range(kw):
                if stride == 1:
                    win = xs[ki:ki + th, kj:kj + ow, :]
                else:
                    win = jax.lax.slice(
                        xs, (ki, kj, 0),
                        (ki + (th - 1) * stride + 1,
                         kj + (ow - 1) * stride + 1, c2),
                        (stride, stride, 1))
                acc = acc + jnp.dot(win.reshape(th * ow, c2),
                                    w_ref[ki * kw + kj],
                                    preferred_element_type=jnp.float32)
        o_ref[...] = acc + b_ref[...]

    return kernel


@functools.partial(jax.jit, static_argnames=("stride", "padding", "use_bf16"))
def complex_conv2d(x, w_real, b_real, w_imag, b_imag, *, stride=1, padding=0,
                   use_bf16=False):
    """x: (N, C, H, W) complex64. weights: (OC, C, KH, KW) f32, biases: (OC,)."""
    n, c, h, w = x.shape
    oc, _, kh, kw = w_real.shape
    c2 = 2 * c
    two_oc = 2 * oc
    oh = (h + 2 * padding - kh) // stride + 1
    ow = (w + 2 * padding - kw) // stride + 1
    wcols = (ow - 1) * stride + kw
    in_elt = 2 if use_bf16 else 4

    # ---- generation-aware VMEM budget -------------------------------------
    try:
        vmem_cap = int(pltpu.get_tpu_info().vmem_capacity_bytes)
    except Exception:
        vmem_cap = 64 << 20                      # conservative (v7x-sized)
    cap = int(0.75 * vmem_cap)                   # 48 MiB v7x, 96 MiB v5e/v6e
    tile_budget = max(8 << 20, int(0.4 * cap))

    # ---- OC tiling (bounds weight/output blocks for large OC) -------------
    if two_oc > 256 and two_oc % 128 == 0:
        toc = 256 if two_oc % 256 == 0 else 128
    else:
        toc = two_oc
    oc_tiles = two_oc // toc

    # ---- output-row band tile TH -------------------------------------------
    def band_bytes(d):
        rows_d = (d - 1) * stride + kh
        return 2 * (rows_d * wcols * c2 * in_elt + d * ow * toc * 4)

    cands = sorted(d for d in range(8, oh + 1, 8) if oh % d == 0) or [oh]
    fits = [d for d in cands if band_bytes(d) <= tile_budget] or [cands[0]]
    deep = [d for d in fits if n * (oh // d) * oc_tiles >= 4]   # >=2/TC on v7x
    th = max(deep) if deep else min(fits)

    rows = (th - 1) * stride + kh
    bands = oh // th
    nb = n * bands

    # ---- input: NHWC with [real | imag] channels, spatially padded --------
    xr = jnp.real(x).astype(jnp.float32)
    xi = jnp.imag(x).astype(jnp.float32)
    x2 = jnp.concatenate([xr, xi], axis=1)                    # (N, 2C, H, W)
    x2 = jnp.transpose(x2, (0, 2, 3, 1))                      # (N, H, W, 2C)
    x2 = jnp.pad(x2, ((0, 0), (padding, padding), (padding, padding), (0, 0)))
    # Overlapping row bands: only KH-1 halo rows per band are duplicated.
    if bands == 1:
        xb = x2[:, :rows, :wcols]
    else:
        xb = jnp.stack(
            [x2[:, t * th * stride:t * th * stride + rows, :wcols]
             for t in range(bands)], axis=1)
        xb = xb.reshape(nb, rows, wcols, c2)

    # ---- fused complex weights / bias --------------------------------------
    wr = jnp.transpose(w_real, (2, 3, 1, 0)).reshape(kh * kw, c, oc)
    wi = jnp.transpose(w_imag, (2, 3, 1, 0)).reshape(kh * kw, c, oc)
    w_all = jnp.concatenate(
        [jnp.concatenate([wr, wi], axis=2),        # rows 0:C   (real input)
         jnp.concatenate([-wi, wr], axis=2)],      # rows C:2C  (imag input)
        axis=1).astype(jnp.float32)                # (KH*KW, 2C, 2*OC)
    b_fused = jnp.concatenate([b_real - b_imag, b_real + b_imag]
                              ).reshape(1, two_oc).astype(jnp.float32)

    if use_bf16:
        xb = xb.astype(jnp.bfloat16)
        w_all = w_all.astype(jnp.bfloat16)
    else:
        xb = xb.astype(jnp.float32)

    # Double-buffered band / weight / bias / output blocks + headroom.
    need = (2 * rows * wcols * c2 * in_elt
            + 2 * kh * kw * c2 * toc * in_elt
            + 2 * toc * 4
            + 2 * th * ow * toc * 4
            + (4 << 20))
    vmem_limit = int(min(cap, max(16 << 20, need)))

    kernel = _make_kernel(kh, kw, stride, th, ow, c2)
    out = pl.pallas_call(
        kernel,
        out_shape=jax.ShapeDtypeStruct((nb, th * ow, two_oc), jnp.float32),
        grid_spec=pltpu.PrefetchScalarGridSpec(
            num_scalar_prefetch=0,
            grid=(nb, oc_tiles),
            in_specs=[
                pl.BlockSpec((None, rows, wcols, c2),
                             lambda s, j: (s, 0, 0, 0)),
                pl.BlockSpec((kh * kw, c2, toc), lambda s, j: (0, 0, j)),
                pl.BlockSpec((1, toc), lambda s, j: (0, j)),
            ],
            out_specs=pl.BlockSpec((None, th * ow, toc),
                                   lambda s, j: (s, 0, j)),
        ),
        compiler_params=pltpu.CompilerParams(
            dimension_semantics=("parallel", "parallel"),
            vmem_limit_bytes=vmem_limit,
        ),
    )(xb, w_all, b_fused)

    # Epilogue: single transpose to NCHW, then split re/im and form complex.
    out = out.reshape(n, oh, ow, two_oc)
    out = jnp.transpose(out, (0, 3, 1, 2))         # (N, 2*OC, OH, OW)
    return jax.lax.complex(out[:, :oc], out[:, oc:])


def _conv_ref(x, w, b, stride, padding):
    out = jax.lax.conv_general_dilated(
        x, w, window_strides=(stride, stride),
        padding=((padding, padding), (padding, padding)),
        dimension_numbers=("NCHW", "OIHW", "NCHW"))
    return out + b.reshape(1, -1, 1, 1)


if __name__ == "__main__":
    # Small shapes consistent with the module: N=2, C_in=4, H=W=16,
    # C_out=8, kernel_size=3, stride=1, padding=1.
    N, C_IN, H, W = 2, 4, 16, 16
    C_OUT, KS, STRIDE, PAD = 8, 3, 1, 1

    key = jax.random.PRNGKey(0)
    k_xr, k_xi, k_wr, k_wi, k_br, k_bi = jax.random.split(key, 6)

    xr = jax.random.normal(k_xr, (N, C_IN, H, W), jnp.float32)
    xi = jax.random.normal(k_xi, (N, C_IN, H, W), jnp.float32)
    x = jax.lax.complex(xr, xi)

    # kaiming_normal_(mode='fan_out', nonlinearity='relu'):
    # std = sqrt(2 / fan_out), fan_out = C_OUT * KS * KS
    fan_out = C_OUT * KS * KS
    std = (2.0 / fan_out) ** 0.5
    w_real = std * jax.random.normal(k_wr, (C_OUT, C_IN, KS, KS), jnp.float32)
    w_imag = std * jax.random.normal(k_wi, (C_OUT, C_IN, KS, KS), jnp.float32)
    # Conv2d default bias init: U(-1/sqrt(fan_in), 1/sqrt(fan_in))
    fan_in = C_IN * KS * KS
    bound = 1.0 / (fan_in ** 0.5)
    b_real = jax.random.uniform(k_br, (C_OUT,), jnp.float32, -bound, bound)
    b_imag = jax.random.uniform(k_bi, (C_OUT,), jnp.float32, -bound, bound)

    out = complex_conv2d(x, w_real, b_real, w_imag, b_imag,
                         stride=STRIDE, padding=PAD)
    out = jax.block_until_ready(out)

    # Reference (plain-JAX convs, same semantics as the PyTorch forward).
    re_ref = (_conv_ref(xr, w_real, b_real, STRIDE, PAD)
              - _conv_ref(xi, w_imag, b_imag, STRIDE, PAD))
    im_ref = (_conv_ref(xi, w_real, b_real, STRIDE, PAD)
              + _conv_ref(xr, w_imag, b_imag, STRIDE, PAD))
    ref = jax.lax.complex(re_ref, im_ref)

    assert out.shape == (N, C_OUT, H, W) and out.dtype == jnp.complex64
    assert jnp.allclose(out, ref, atol=1e-4, rtol=1e-4)
    print("KERNEL_OK")
</pallas_src>

<mosaic_0001>
module attributes {stable_mosaic.version = 11 : i64} {
  func.func @kernel(%arg0: i32, %arg1: i32, %arg2: memref<1x10x18x8xf32, #tpu.memory_space<vmem>>, %arg3: memref<9x8x16xf32, #tpu.memory_space<vmem>>, %arg4: memref<1x16xf32, #tpu.memory_space<vmem>>, %arg5: memref<1x128x16xf32, #tpu.memory_space<vmem>>) attributes {dimension_semantics = [#tpu.dimension_semantics<parallel>, #tpu.dimension_semantics<parallel>], iteration_bounds = array<i64: 4, 1>, scalar_prefetch = 0 : i64, scratch_operands = 0 : i64, tpu.core_type = #tpu.core_type<tc>, window_params = [{transform_indices = @transform_0, window_bounds = array<i64: 1, 10, 18, 8>}, {transform_indices = @transform_1, window_bounds = array<i64: 9, 8, 16>}, {transform_indices = @transform_2, window_bounds = array<i64: 1, 16>}, {transform_indices = @transform_3, window_bounds = array<i64: 1, 128, 16>}]} {
    %c0 = arith.constant 0 : index
    %c0_0 = arith.constant 0 : index
    %c0_1 = arith.constant 0 : index
    %c0_2 = arith.constant 0 : index
    %0 = vector.load %arg2[%c0, %c0_0, %c0_1, %c0_2] : memref<1x10x18x8xf32, #tpu.memory_space<vmem>>, vector<1x10x18x8xf32>
    %1 = vector.shape_cast %0 : vector<1x10x18x8xf32> to vector<10x18x8xf32>
    %cst = arith.constant 0.000000e+00 : f32
    %2 = vector.broadcast %cst : f32 to vector<128x16xf32>
    %3 = vector.extract_strided_slice %1 {offsets = [0, 0, 0], sizes = [8, 16, 8], strides = [1, 1, 1]} : vector<10x18x8xf32> to vector<8x16x8xf32>
    %4 = vector.shape_cast %3 : vector<8x16x8xf32> to vector<128x8xf32>
    %c0_3 = arith.constant 0 : index
    %c0_4 = arith.constant 0 : index
    %c0_5 = arith.constant 0 : index
    %5 = vector.load %arg3[%c0_3, %c0_4, %c0_5] : memref<9x8x16xf32, #tpu.memory_space<vmem>>, vector<1x8x16xf32>
    %6 = vector.shape_cast %5 : vector<1x8x16xf32> to vector<8x16xf32>
    %cst_6 = arith.constant dense<0.000000e+00> : vector<128x16xf32>
    %7 = tpu.matmul %4, %6, %cst_6 {dimension_numbers = #tpu.dot_dimension_numbers<[1], [0], [0], [1], [0, 0, 1, 1], [], []>} : vector<128x8xf32>, vector<8x16xf32>, vector<128x16xf32> -> vector<128x16xf32>
    %8 = arith.addf %2, %7 : vector<128x16xf32>
    %9 = vector.extract_strided_slice %1 {offsets = [0, 1, 0], sizes = [8, 16, 8], strides = [1, 1, 1]} : vector<10x18x8xf32> to vector<8x16x8xf32>
    %10 = vector.shape_cast %9 : vector<8x16x8xf32> to vector<128x8xf32>
    %c1 = arith.constant 1 : index
    %c0_7 = arith.constant 0 : index
    %c0_8 = arith.constant 0 : index
    %11 = vector.load %arg3[%c1, %c0_7, %c0_8] : memref<9x8x16xf32, #tpu.memory_space<vmem>>, vector<1x8x16xf32>
    %12 = vector.shape_cast %11 : vector<1x8x16xf32> to vector<8x16xf32>
    %cst_9 = arith.constant dense<0.000000e+00> : vector<128x16xf32>
    %13 = tpu.matmul %10, %12, %cst_9 {dimension_numbers = #tpu.dot_dimension_numbers<[1], [0], [0], [1], [0, 0, 1, 1], [], []>} : vector<128x8xf32>, vector<8x16xf32>, vector<128x16xf32> -> vector<128x16xf32>
    %14 = arith.addf %8, %13 : vector<128x16xf32>
    %15 = vector.extract_strided_slice %1 {offsets = [0, 2, 0], sizes = [8, 16, 8], strides = [1, 1, 1]} : vector<10x18x8xf32> to vector<8x16x8xf32>
    %16 = vector.shape_cast %15 : vector<8x16x8xf32> to vector<128x8xf32>
    %c2 = arith.constant 2 : index
    %c0_10 = arith.constant 0 : index
    %c0_11 = arith.constant 0 : index
    %17 = vector.load %arg3[%c2, %c0_10, %c0_11] : memref<9x8x16xf32, #tpu.memory_space<vmem>>, vector<1x8x16xf32>
    %18 = vector.shape_cast %17 : vector<1x8x16xf32> to vector<8x16xf32>
    %cst_12 = arith.constant dense<0.000000e+00> : vector<128x16xf32>
    %19 = tpu.matmul %16, %18, %cst_12 {dimension_numbers = #tpu.dot_dimension_numbers<[1], [0], [0], [1], [0, 0, 1, 1], [], []>} : vector<128x8xf32>, vector<8x16xf32>, vector<128x16xf32> -> vector<128x16xf32>
    %20 = arith.addf %14, %19 : vector<128x16xf32>
    %21 = vector.extract_strided_slice %1 {offsets = [1, 0, 0], sizes = [8, 16, 8], strides = [1, 1, 1]} : vector<10x18x8xf32> to vector<8x16x8xf32>
    %22 = vector.shape_cast %21 : vector<8x16x8xf32> to vector<128x8xf32>
    %c3 = arith.constant 3 : index
    %c0_13 = arith.constant 0 : index
    %c0_14 = arith.constant 0 : index
    %23 = vector.load %arg3[%c3, %c0_13, %c0_14] : memref<9x8x16xf32, #tpu.memory_space<vmem>>, vector<1x8x16xf32>
    %24 = vector.shape_cast %23 : vector<1x8x16xf32> to vector<8x16xf32>
    %cst_15 = arith.constant dense<0.000000e+00> : vector<128x16xf32>
    %25 = tpu.matmul %22, %24, %cst_15 {dimension_numbers = #tpu.dot_dimension_numbers<[1], [0], [0], [1], [0, 0, 1, 1], [], []>} : vector<128x8xf32>, vector<8x16xf32>, vector<128x16xf32> -> vector<128x16xf32>
    %26 = arith.addf %20, %25 : vector<128x16xf32>
    %27 = vector.extract_strided_slice %1 {offsets = [1, 1, 0], sizes = [8, 16, 8], strides = [1, 1, 1]} : vector<10x18x8xf32> to vector<8x16x8xf32>
    %28 = vector.shape_cast %27 : vector<8x16x8xf32> to vector<128x8xf32>
    %c4 = arith.constant 4 : index
    %c0_16 = arith.constant 0 : index
    %c0_17 = arith.constant 0 : index
    %29 = vector.load %arg3[%c4, %c0_16, %c0_17] : memref<9x8x16xf32, #tpu.memory_space<vmem>>, vector<1x8x16xf32>
    %30 = vector.shape_cast %29 : vector<1x8x16xf32> to vector<8x16xf32>
    %cst_18 = arith.constant dense<0.000000e+00> : vector<128x16xf32>
    %31 = tpu.matmul %28, %30, %cst_18 {dimension_numbers = #tpu.dot_dimension_numbers<[1], [0], [0], [1], [0, 0, 1, 1], [], []>} : vector<128x8xf32>, vector<8x16xf32>, vector<128x16xf32> -> vector<128x16xf32>
    %32 = arith.addf %26, %31 : vector<128x16xf32>
    %33 = vector.extract_strided_slice %1 {offsets = [1, 2, 0], sizes = [8, 16, 8], strides = [1, 1, 1]} : vector<10x18x8xf32> to vector<8x16x8xf32>
    %34 = vector.shape_cast %33 : vector<8x16x8xf32> to vector<128x8xf32>
    %c5 = arith.constant 5 : index
    %c0_19 = arith.constant 0 : index
    %c0_20 = arith.constant 0 : index
    %35 = vector.load %arg3[%c5, %c0_19, %c0_20] : memref<9x8x16xf32, #tpu.memory_space<vmem>>, vector<1x8x16xf32>
    %36 = vector.shape_cast %35 : vector<1x8x16xf32> to vector<8x16xf32>
    %cst_21 = arith.constant dense<0.000000e+00> : vector<128x16xf32>
    %37 = tpu.matmul %34, %36, %cst_21 {dimension_numbers = #tpu.dot_dimension_numbers<[1], [0], [0], [1], [0, 0, 1, 1], [], []>} : vector<128x8xf32>, vector<8x16xf32>, vector<128x16xf32> -> vector<128x16xf32>
    %38 = arith.addf %32, %37 : vector<128x16xf32>
    %39 = vector.extract_strided_slice %1 {offsets = [2, 0, 0], sizes = [8, 16, 8], strides = [1, 1, 1]} : vector<10x18x8xf32> to vector<8x16x8xf32>
    %40 = vector.shape_cast %39 : vector<8x16x8xf32> to vector<128x8xf32>
    %c6 = arith.constant 6 : index
    %c0_22 = arith.constant 0 : index
    %c0_23 = arith.constant 0 : index
    %41 = vector.load %arg3[%c6, %c0_22, %c0_23] : memref<9x8x16xf32, #tpu.memory_space<vmem>>, vector<1x8x16xf32>
    %42 = vector.shape_cast %41 : vector<1x8x16xf32> to vector<8x16xf32>
    %cst_24 = arith.constant dense<0.000000e+00> : vector<128x16xf32>
    %43 = tpu.matmul %40, %42, %cst_24 {dimension_numbers = #tpu.dot_dimension_numbers<[1], [0], [0], [1], [0, 0, 1, 1], [], []>} : vector<128x8xf32>, vector<8x16xf32>, vector<128x16xf32> -> vector<128x16xf32>
    %44 = arith.addf %38, %43 : vector<128x16xf32>
    %45 = vector.extract_strided_slice %1 {offsets = [2, 1, 0], sizes = [8, 16, 8], strides = [1, 1, 1]} : vector<10x18x8xf32> to vector<8x16x8xf32>
    %46 = vector.shape_cast %45 : vector<8x16x8xf32> to vector<128x8xf32>
    %c7 = arith.constant 7 : index
    %c0_25 = arith.constant 0 : index
    %c0_26 = arith.constant 0 : index
    %47 = vector.load %arg3[%c7, %c0_25, %c0_26] : memref<9x8x16xf32, #tpu.memory_space<vmem>>, vector<1x8x16xf32>
    %48 = vector.shape_cast %47 : vector<1x8x16xf32> to vector<8x16xf32>
    %cst_27 = arith.constant dense<0.000000e+00> : vector<128x16xf32>
    %49 = tpu.matmul %46, %48, %cst_27 {dimension_numbers = #tpu.dot_dimension_numbers<[1], [0], [0], [1], [0, 0, 1, 1], [], []>} : vector<128x8xf32>, vector<8x16xf32>, vector<128x16xf32> -> vector<128x16xf32>
    %50 = arith.addf %44, %49 : vector<128x16xf32>
    %51 = vector.extract_strided_slice %1 {offsets = [2, 2, 0], sizes = [8, 16, 8], strides = [1, 1, 1]} : vector<10x18x8xf32> to vector<8x16x8xf32>
    %52 = vector.shape_cast %51 : vector<8x16x8xf32> to vector<128x8xf32>
    %c8 = arith.constant 8 : index
    %c0_28 = arith.constant 0 : index
    %c0_29 = arith.constant 0 : index
    %53 = vector.load %arg3[%c8, %c0_28, %c0_29] : memref<9x8x16xf32, #tpu.memory_space<vmem>>, vector<1x8x16xf32>
    %54 = vector.shape_cast %53 : vector<1x8x16xf32> to vector<8x16xf32>
    %cst_30 = arith.constant dense<0.000000e+00> : vector<128x16xf32>
    %55 = tpu.matmul %52, %54, %cst_30 {dimension_numbers = #tpu.dot_dimension_numbers<[1], [0], [0], [1], [0, 0, 1, 1], [], []>} : vector<128x8xf32>, vector<8x16xf32>, vector<128x16xf32> -> vector<128x16xf32>
    %56 = arith.addf %50, %55 : vector<128x16xf32>
    %c0_31 = arith.constant 0 : index
    %c0_32 = arith.constant 0 : index
    %57 = vector.load %arg4[%c0_31, %c0_32] : memref<1x16xf32, #tpu.memory_space<vmem>>, vector<1x16xf32>
    %58 = vector.broadcast %57 : vector<1x16xf32> to vector<128x16xf32>
    %59 = arith.addf %56, %58 : vector<128x16xf32>
    %c0_33 = arith.constant 0 : index
    %c0_34 = arith.constant 0 : index
    %c0_35 = arith.constant 0 : index
    %60 = vector.load %arg5[%c0_33, %c0_34, %c0_35] : memref<1x128x16xf32, #tpu.memory_space<vmem>>, vector<1x128x16xf32>
    %61 = vector.shape_cast %60 : vector<1x128x16xf32> to vector<128x16xf32>
    %62 = vector.shape_cast %59 : vector<128x16xf32> to vector<1x128x16xf32>
    tpu.vector_store %arg5[%c0_33, %c0_34, %c0_35], %62 {strides = array<i32>} : memref<1x128x16xf32, #tpu.memory_space<vmem>>, vector<1x128x16xf32>,
    return
  }
  func.func @transform_0(%arg0: i32, %arg1: i32) -> (i32, i32, i32, i32) {
    %c0_i32 = arith.constant 0 : i32
    %c0_i32_0 = arith.constant 0 : i32
    %c0_i32_1 = arith.constant 0 : i32
    %c0_i32_2 = arith.constant 0 : i32
    return %arg0, %c0_i32, %c0_i32_0, %c0_i32_1 : i32, i32, i32, i32
  }
  func.func @transform_1(%arg0: i32, %arg1: i32) -> (i32, i32, i32) {
    %c0_i32 = arith.constant 0 : i32
    %c0_i32_0 = arith.constant 0 : i32
    %c0_i32_1 = arith.constant 0 : i32
    return %c0_i32, %c0_i32_0, %arg1 : i32, i32, i32
  }
  func.func @transform_2(%arg0: i32, %arg1: i32) -> (i32, i32) {
    %c0_i32 = arith.constant 0 : i32
    %c0_i32_0 = arith.constant 0 : i32
    return %c0_i32, %arg1 : i32, i32
  }
  func.func @transform_3(%arg0: i32, %arg1: i32) -> (i32, i32, i32) {
    %c0_i32 = arith.constant 0 : i32
    %c0_i32_0 = arith.constant 0 : i32
    return %arg0, %c0_i32, %arg1 : i32, i32, i32
  }
}

</mosaic_0001>

<bundles_post_ra>
// kernel: neg.1
= control target key start
LH: loop header
LB: loop body
LE: loop exit
PB: predicated region body
PF: predicated region fallthrough
CT: control target
= control target key end

     0   :  { %2 = vsyncpa [#allocation1], 0  ;;  %s118_s6 = smov [#allocation0]   ;;  %s161_s0 = inlined_call_operand.hbm [shape: f32[9,4,8], index: 0, kind: input, shape index: {}]   ;;  %s162_s1 = inlined_call_operand.vmem [shape: f32[9,4,8], index: 1, kind: output, shape index: {}]  }
   0x1   :  { %s6_s7 = sshll.u32 %s118_s6, 4  ;;  %s7_s7 = int_to_ptr.vmem [resolvable:$true] %s6_s7 }
   0x2   :  { %s104_s8 = scalar_lea.vmem %s7_s7, 576  ;;  %p109_p1 = scmp.lt.s32.totalorder %s7_s7, %s7_s7 }
   0x3   :  { %p105_p0 = scmp.ne.s32.totalorder %s7_s7, %s104_s8  ;;  %p110_p2 = scmp.lt.s32.totalorder %s104_s8, %s104_s8 }
   0x5   :  { %p111_p3 = por %p110_p2, %p109_p1 }
   0x7   :  { %p112_p4 = pnand %p111_p3, %p105_p0 }
   0x9   :  { %115 = shalt.err (!%p112_p4)
}
   0xa   :  { %s119_s9 = smov 64   ;;  %s120_s10 = smov 4  }
   0xb   :  { %12 = dma.hbm_to_vmem [thread:$0]  %s161_s0, 576, %s7_s7, [#allocation1], %s119_s9, %s119_s9, %s120_s10  }
   0xc   :  { %116 = dma.done.wait [#allocation1], 576  }
   0xd   :  { %117 = vsyncadd [#allocation1], 4294966720  ;;  %v14_v0 = vld [vmem:[#allocation0] sm:$0xf]  ;;  %v21_v1 = vld [vmem:[#allocation0 + $0x4] sm:$0xf] }
   0xe   :  { %v29_v2 = vld [vmem:[#allocation0 + $0x8] sm:$0xf]  ;;  %v17_v3 = vxor.u32 2147483648, %v14_v0  ;;  %v24_v4 = vxor.u32 2147483648, %v21_v1  ;;  %v37_v6 = vld [vmem:[#allocation0 + $0xc] sm:$0xf] }
   0xf   :  { %v32_v5 = vxor.u32 2147483648, %v29_v2  ;;  %v40_v7 = vxor.u32 2147483648, %v37_v6  ;;  %v45_v8 = vld [vmem:[#allocation0 + $0x10] sm:$0xf]  ;;  %v53_v9 = vld [vmem:[#allocation0 + $0x14] sm:$0xf] }
  0x10   :  { %19 = vst [vmem:[%s162_s1] sm:$0xf] %v17_v3  ;;  %85 = vst [vmem:[%s162_s1 + $0x4] sm:$0xf] %v24_v4  ;;  %v48_v10 = vxor.u32 2147483648, %v45_v8  ;;  %v56_v11 = vxor.u32 2147483648, %v53_v9 }
  0x11   :  { %86 = vst [vmem:[%s162_s1 + $0x8] sm:$0xf] %v32_v5  ;;  %v61_v12 = vld [vmem:[#allocation0 + $0x18] sm:$0xf]  ;;  %v69_v13 = vld [vmem:[#allocation0 + $0x1c] sm:$0xf] }
  0x12   :  { %87 = vst [vmem:[%s162_s1 + $0xc] sm:$0xf] %v40_v7  ;;  %v64_v14 = vxor.u32 2147483648, %v61_v12  ;;  %v72_v15 = vxor.u32 2147483648, %v69_v13  ;;  %v77_v16 = vld [vmem:[#allocation0 + $0x20] sm:$0xf] }
  0x13   :  { %88 = vst [vmem:[%s162_s1 + $0x10] sm:$0xf] %v48_v10  ;;  %89 = vst [vmem:[%s162_s1 + $0x14] sm:$0xf] %v56_v11  ;;  %v80_v17 = vxor.u32 2147483648, %v77_v16 }
  0x14   :  { %90 = vst [vmem:[%s162_s1 + $0x18] sm:$0xf] %v64_v14  ;;  %91 = vst [vmem:[%s162_s1 + $0x1c] sm:$0xf] %v72_v15 }
  0x15   :  { %92 = vst [vmem:[%s162_s1 + $0x20] sm:$0xf] %v80_v17 }
  0x16   :  { %84 = vsyncpa [#allocation1], 1 }

// kernel: custom-call.1
= control target key start
LH: loop header
LB: loop body
LE: loop exit
PB: predicated region body
PF: predicated region fallthrough
CT: control target
= control target key end

     0   :  { %s51_s0 = inlined_call_operand.hbm [shape: c64[2,4,16,16], index: 0, kind: input, shape index: {}]   ;;  %s52_s1 = inlined_call_operand.vmem [shape: f32[2,4,16,16], index: 1, kind: output, shape index: {}]  }
   0x1   :  { %s2_s8 = scalar_lea.hbm %s51_s0, 2048 }
   0x2   :  { %3 = vsyncpa [#allocation0], 0  ;;  %s4_s11 = sshll.u32 %s52_s1, 4  ;;  %s5_s11 = int_to_ptr.vmem [resolvable:$true] %s4_s11 }
   0x3   :  { %s20_s12 = scalar_lea.vmem %s5_s11, 2048  ;;  %p25_p1 = scmp.lt.s32.totalorder %s5_s11, %s5_s11 }
   0x4   :  { %p21_p0 = scmp.ne.s32.totalorder %s5_s11, %s20_s12  ;;  %p26_p2 = scmp.lt.s32.totalorder %s20_s12, %s20_s12 }
   0x6   :  { %p27_p3 = por %p26_p2, %p25_p1 }
   0x8   :  { %p28_p4 = pnand %p27_p3, %p21_p0 }
   0xa   :  { %31 = shalt.err (!%p28_p4)  }
   0xb   :  { %7 = dma.hbm_to_vmem [thread:$0]  %s2_s8, 2048, %s5_s11, [#allocation0] }
   0xc   :  { %33 = dma.done.wait [#allocation0], 2048  }
   0xd   :  { %34 = vsyncadd [#allocation0], 4294965248 }
   0xe   :  { %9 = vsyncpa [#allocation0], 1 }

// kernel: custom-call
= control target key start
LH: loop header
LB: loop body
LE: loop exit
PB: predicated region body
PF: predicated region fallthrough
CT: control target
= control target key end

     0   :  { %2 = vsyncpa [#allocation0], 0  ;;  %s47_s0 = inlined_call_operand.hbm [shape: c64[2,4,16,16], index: 0, kind: input, shape index: {}]   ;;  %s48_s1 = inlined_call_operand.vmem [shape: f32[2,4,16,16], index: 1, kind: output, shape index: {}]  }
   0x1   :  { %s3_s8 = sshll.u32 %s48_s1, 4  ;;  %s4_s8 = int_to_ptr.vmem [resolvable:$true] %s3_s8 }
   0x2   :  { %s17_s9 = scalar_lea.vmem %s4_s8, 2048  ;;  %p22_p1 = scmp.lt.s32.totalorder %s4_s8, %s4_s8 }
   0x3   :  { %p18_p0 = scmp.ne.s32.totalorder %s4_s8, %s17_s9  ;;  %p23_p2 = scmp.lt.s32.totalorder %s17_s9, %s17_s9 }
   0x5   :  { %p24_p3 = por %p23_p2, %p22_p1 }
   0x7   :  { %p25_p4 = pnand %p24_p3, %p18_p0 }
   0x9   :  { %28 = shalt.err (!%p25_p4)  }
   0xa   :  { %6 = dma.hbm_to_vmem [thread:$0]  %s47_s0, 2048, %s4_s8, [#allocation0] }
   0xb   :  { %29 = dma.done.wait [#allocation0], 2048  }
   0xc   :  { %30 = vsyncadd [#allocation0], 4294965248 }
   0xd   :  { %8 = vsyncpa [#allocation0], 1 }

// kernel: custom-call.2
= control target key start
LH: loop header
LB: loop body
LE: loop exit
PB: predicated region body
PF: predicated region fallthrough
CT: control target
= control target key end

     0   :  { %s92_s0 = inlined_call_operand.vmem [shape: f32[2,8,16,16], index: 0, kind: input, shape index: {}]   ;;  %s93_s1 = inlined_call_operand.vmem [shape: f32[2,8,16,16], index: 1, kind: input, shape index: {}]   ;;  %s94_s2 = inlined_call_operand.hbm [shape: c64[2,8,16,16], index: 2, kind: output, shape index: {}]  }
   0x1   :  { %s3_s11 = scalar_lea.hbm %s94_s2, 4096 }
   0x2   :  { %4 = vsyncpa [#allocation0], 0  ;;  %s5_s14 = sshll.u32 %s92_s0, 4  ;;  %s6_s14 = int_to_ptr.vmem [resolvable:$true] %s5_s14 }
   0x3   :  { %s18_s15 = scalar_lea.vmem %s6_s14, 4096  ;;  %p23_p1 = scmp.lt.s32.totalorder %s6_s14, %s6_s14 }
   0x4   :  { %p19_p0 = scmp.ne.s32.totalorder %s6_s14, %s18_s15  ;;  %p24_p2 = scmp.lt.s32.totalorder %s18_s15, %s18_s15 }
   0x6   :  { %p25_p3 = por %p24_p2, %p23_p1 }
   0x8   :  { %p26_p4 = pnand %p25_p3, %p19_p0 }
   0xa   :  { %29 = shalt.err (!%p26_p4)  }
   0xb   :  { %8 = dma.vmem_to_hbm [thread:$0]  %s6_s14, 4096, %s94_s2, [#allocation0] }
   0xc   :  { %61 = dma.done.wait [#allocation0], 4096  }
   0xd   :  { %62 = vsyncadd [#allocation0], 4294963200 }
   0xe   :  { %10 = vsyncpa [#allocation0], 1 }
   0xf   :  { %11 = vsyncpa [#allocation1], 0  ;;  %s12_s0 = sshll.u32 %s93_s1, 4  ;;  %s13_s0 = int_to_ptr.vmem [resolvable:$true] %s12_s0 }
  0x10   :  { %s38_s20 = scalar_lea.vmem %s13_s0, 4096  ;;  %p43_p6 = scmp.lt.s32.totalorder %s13_s0, %s13_s0 }
  0x11   :  { %p39_p5 = scmp.ne.s32.totalorder %s13_s0, %s38_s20  ;;  %p44_p7 = scmp.lt.s32.totalorder %s38_s20, %s38_s20 }
  0x13   :  { %p45_p8 = por %p44_p7, %p43_p6 }
  0x15   :  { %p46_p9 = pnand %p45_p8, %p39_p5 }
  0x17   :  { %49 = shalt.err (!%p46_p9)  }
  0x18   :  { %15 = dma.vmem_to_hbm [thread:$0]  %s13_s0, 4096, %s3_s11, [#allocation1] }
  0x19   :  { %63 = dma.done.wait [#allocation1], 4096  }
  0x1a   :  { %64 = vsyncadd [#allocation1], 4294963200 }
  0x1b   :  { %17 = vsyncpa [#allocation1], 1 }

// kernel: complex_conv2d.1
= control target key start
LH: loop header
LB: loop body
LE: loop exit
PB: predicated region body
PF: predicated region fallthrough
CT: control target
= control target key end

     0   :  { %s2708_s12 = smov 0   ;;  %s2710_s13 = smov 0   ;;  %s3575_s0 = inlined_call_operand.vmem [shape: f32[4,10,18,8], index: 0, kind: input, shape index: {}]   ;;  %s3576_s1 = inlined_call_operand.vmem [shape: f32[9,8,16], index: 1, kind: input, shape index: {}]   ;;  %s3577_s2 = inlined_call_operand.vmem [shape: f32[1,16], index: 2, kind: input, shape index: {}]   ;;  %s3578_s3 = inlined_call_operand.vmem [shape: f32[4,128,16], index: 3, kind: output, shape index: {}]  }
   0x1   :  { %s2712_s14 = smov 0  }
   0x2 LB: > { %s25_s15 = sadd.s32 1, %s2682_s13  ;;  %p2090_p0 = scmp.ge.s32.totalorder %s2686_s14, 1  ;;  %s2686_s14 = sphi %s2712_s14, %s13_s14   ;;  %s2682_s13 = sphi %s2710_s13, %s3618_s13   ;;  %s2678_s12 = sphi %s2708_s12, %s3617_s12  }
   0x3   : > { %p27_p1 = scmp.ge.s32.totalorder %s25_s15, 4  ;;  %p168_p2 = scmp.lt.s32.totalorder %s2686_s14, 5 }
   0x5   : > { %s3620_s15 = smov (%p27_p1, %s25_s15), 0  ;;  %p169_p3 = pnand %p2090_p0, %p168_p2 }
   0x7   : > { %172 = sbr.rel (%p169_p3) target bundleno = 366 (0x16e), region = 32 }
   0xc   : > { %v2094_v0 = vld [vmem:[%s3576_s1 + $0x8] sm:$0xff]  ;;  %p202_p4 = scmp.lt.s32.totalorder %s2678_s12, 3  ;;  %v252_v1 = vld [vmem:[%s3576_s1] sm:$0xff]  ;;  %v2127_v2 = vld [vmem:[%s3576_s1 + $0x10] sm:$0xff]  ;;  %vm277_vm0 = vcmask 1046528   ;;  %vm320_vm1 = vcmask 64512  }
   0xd   : > { %2637 = vmatprep.subr.mxu1 %v2094_v0  ;;  %2403 = vmatprep.subr.mxu0 %v2094_v0  ;;  %v2784_v21 = vld [vmem:[%s3576_s1 + $0x18] sm:$0xff]  ;;  %v2802_v28 = vld [vmem:[%s3576_s1 + $0x20] sm:$0xff]  ;;  %vm675_vm2 = vcmask 1045504   ;;  %vm1962_vm3 = vcmask 130048  }
   0xe   : > { %2638 = vmatpush3.msra.mxu1 %v2094_v0  ;;  %2404 = vmatpush3.msra.mxu0 %v2094_v0  ;;  %s3622_s12 = smov (!%p202_p4, %s2678_s12), 3 }
   0xf   : > { %2429 = vmatprep.subr.mxu1 %v252_v1  ;;  %2455 = vmatprep.subr.mxu0 %v2127_v2  ;;  %s2639_s22 = smul.u32 240, %s3622_s12  ;;  %s2249_s11 = sshll.u32 %s3622_s12, 7 }
  0x10   : > { %s3470_s19 = scalar_lea.vmem %s3578_s3, %s2249_s11 }
  0x11   : > { %s2741_s25 = scalar_lea.vmem %s3575_s0, %s2639_s22 }
  0x12   : > { %v2744_v3 = vld [vmem:[%s2741_s25] sm:$0xff]  ;;  %v2747_v4 = vld [vmem:[%s2741_s25 + $0x8] sm:$0xff]  ;;  %v2759_v10 = vld [vmem:[%s2741_s25 + $0x10] sm:$0x3] }
  0x13   : > { %v2750_v5 = vld [vmem:[%s2741_s25 + $0x60] sm:$0xff]  ;;  %v278_v6 = vrot.slane %v2744_v3, 1  ;;  %v279_v7 = vrot.slane %v2747_v4, 1  ;;  %v2755_v8 = vld [vmem:[%s2741_s25 + $0x68] sm:$0xff]  ;;  %v281_v12 = vrot.slane %v2759_v10, 1  ;;  %v2767_v14 = vld [vmem:[%s2741_s25 + $0x18] sm:$0xff] }
  0x14   : > { %v298_v9 = vrot.slane %v2750_v5, 1  ;;  %v299_v11 = vrot.slane %v2755_v8, 1  ;;  %v2764_v13 = vld [vmem:[%s2741_s25 + $0x70] sm:$0x3]  ;;  %v2772_v17 = vld [vmem:[%s2741_s25 + $0x20] sm:$0xff]  ;;  %v283_v18 = vrot.slane %v2767_v14, 1 }
  0x15   : > { %v280_v15 = vsel %vm277_vm0, %v278_v6, %v279_v7  ;;  %v301_v16 = vrot.slane %v2764_v13, 1  ;;  %v2776_v19 = vld [vmem:[%s2741_s25 + $0x78] sm:$0xff]  ;;  %v2779_v20 = vld [vmem:[%s2741_s25 + $0x80] sm:$0xff]  ;;  %v282_v23 = vsel %vm277_vm0, %v279_v7, %v281_v12  ;;  %v284_v24 = vrot.slane %v2772_v17, 1  ;;  %v2794_v26 = vld [vmem:[%s2741_s25 + $0x28] sm:$0x3] }
  0x16   : > { %2405 = vmatprep.mubr.msk.f32.mxu0 %vm320_vm1, %v280_v15  ;;  %v2788_v22 = vsel %vm277_vm0, %v298_v9, %v299_v11  ;;  %v303_v25 = vrot.slane %v2776_v19, 1  ;;  %v2797_v27 = vld [vmem:[%s2741_s25 + $0x88] sm:$0x3]  ;;  %v304_v30 = vrot.slane %v2779_v20, 1  ;;  %v286_v31 = vrot.slane %v2794_v26, 1  ;;  %v2814_v33 = vld [vmem:[%s2741_s25 + $0x30] sm:$0xff] }
  0x17   : > { %2417 = vmatprep.mubr.msk.f32.mxu1 %vm320_vm1, %v2788_v22  ;;  %2406 = vmatmul.mubr.msk.f32.vlgmr.msra.gmra.mxu0 %vm320_vm1, %v282_v23  ;;  %v2808_v29 = vsel %vm277_vm0, %v299_v11, %v301_v16  ;;  %v306_v32 = vrot.slane %v2797_v27, 1  ;;  %v2817_v34 = vld [vmem:[%s2741_s25 + $0x38] sm:$0xff]  ;;  %v2820_v35 = vld [vmem:[%s2741_s25 + $0x90] sm:$0xff]  ;;  %v2825_v36 = vsel %vm277_vm0, %v283_v18, %v284_v24  ;;  %v288_v37 = vrot.slane %v2814_v33, 1  ;;  %v2834_v41 = vld [vmem:[%s2741_s25 + $0x40] sm:$0x3] }
  0x18   : > { %2418 = vmatmul.mubr.msk.f32.vlgmr.msra.gmra.mxu1 %vm320_vm1, %v2808_v29  ;;  %2456 = vmatpush3.msra.mxu0 %v2127_v2  ;;  %v289_v38 = vrot.slane %v2817_v34, 1  ;;  %v2830_v39 = vld [vmem:[%s2741_s25 + $0x98] sm:$0xff]  ;;  %v308_v40 = vrot.slane %v2820_v35, 1  ;;  %v2839_v42 = vsel %vm277_vm0, %v303_v25, %v304_v30  ;;  %v2842_v43 = vsel %vm277_vm0, %v284_v24, %v286_v31  ;;  %v2849_v46 = vld [vmem:[%s2741_s25 + $0xa0] sm:$0x3]  ;;  %v2852_v47 = vld [vmem:[%s2741_s25 + $0x48] sm:$0xff] }
  0x19   : > { %2430 = vmatpush3.msra.mxu1 %v252_v1  ;;  %2408 = vmatprep.mubr.msk.f32.mxu0 %vm320_vm1, %v2825_v36  ;;  %v2845_v44 = vsel %vm277_vm0, %v304_v30, %v306_v32  ;;  %v309_v45 = vrot.slane %v2830_v39, 1  ;;  %v2855_v48 = vld [vmem:[%s2741_s25 + $0x50] sm:$0xff]  ;;  %v291_v50 = vrot.slane %v2834_v41, 1  ;;  %v311_v51 = vrot.slane %v2849_v46, 1  ;;  %v2866_v53 = vld [vmem:[%s2741_s25 + $0xa8] sm:$0xff]  ;;  %v2930_v18 = vld [vmem:[%s2741_s25 + $0xc0] sm:$0xff] }
  0x1a   : > { %2420 = vmatprep.mubr.msk.f32.mxu1 %vm320_vm1, %v2839_v42  ;;  %v2860_v49 = vsel %vm277_vm0, %v288_v37, %v289_v38  ;;  %v293_v52 = vrot.slane %v2852_v47, 1  ;;  %v2869_v54 = vld [vmem:[%s2741_s25 + $0xb0] sm:$0xff]  ;;  %2481 = vmatprep.subr.mxu1 %v2784_v21  ;;  %v294_v56 = vrot.slane %v2855_v48, 1  ;;  %v313_v57 = vrot.slane %v2866_v53, 1  ;;  %v2881_v59 = vld [vmem:[%s2741_s25 + $0x58] sm:$0x3] }
  0x1b   : > { %2409 = vmatmul.mubr.msk.f32.gmra.mxu0 %vm320_vm1, %v2842_v43  ;;  %v2875_v55 = vsel %vm277_vm0, %v308_v40, %v309_v45  ;;  %v314_v58 = vrot.slane %v2869_v54, 1  ;;  %2507 = vmatprep.subr.mxu0 %v2802_v28  ;;  %v2889_v60 = vsel %vm277_vm0, %v289_v38, %v291_v50  ;;  %v296_v61 = vrot.slane %v2881_v59, 1  ;;  %v2893_v62 = vld [vmem:[%s2741_s25 + $0xb8] sm:$0x3]  ;;  %v2940_v31 = vld [vmem:[%s2741_s25 + $0xc8] sm:$0xff] }
  0x1c   : > { %2421 = vmatmul.mubr.msk.f32.gmra.mxu1 %vm320_vm1, %v2845_v44  ;;  %2411 = vmatprep.mubr.msk.f32.mxu0 %vm320_vm1, %v2860_v49  ;;  %v676_v63 = vrot.slane %v2744_v3, 2  ;;  %v2899_v0 = vsel %vm277_vm0, %v309_v45, %v311_v51  ;;  %v2902_v1 = vsel %vm277_vm0, %v293_v52, %v294_v56  ;;  %v316_v2 = vrot.slane %v2893_v62, 1  ;;  %v248_v32 = vld [vmem:[%s2741_s25 + $0xd0] sm:$0x3]  ;;  %v2957_v50 = vld [vmem:[%s2741_s25 + $0xd8] sm:$0xff] }
  0x1d   : > { %2423 = vmatprep.mubr.msk.f32.mxu1 %vm320_vm1, %v2875_v55  ;;  %v677_v6 = vrot.slane %v2747_v4, 2  ;;  %v2907_v7 = vsel %vm277_vm0, %v313_v57, %v314_v58  ;;  %v679_v9 = vrot.slane %v2759_v10, 2  ;;  %v2917_v11 = vsel %vm277_vm0, %v294_v56, %v296_v61  ;;  %v251_v56 = vld [vmem:[%s2741_s25 + $0xe8] sm:$0x3]  ;;  %v2976_v61 = vld [vmem:[%s3576_s1 + $0x30] sm:$0xff] }
  0x1e   : > { %v2922_v12 = vsel %vm277_vm0, %v314_v58, %v316_v2  ;;  %v681_v10 = vrot.slane %v2767_v14, 2  ;;  %v682_v16 = vrot.slane %v2772_v17, 2  ;;  %v684_v24 = vrot.slane %v2794_v26, 2  ;;  %v2953_v26 = vld [vmem:[%s3576_s1 + $0x28] sm:$0xff] }
  0x1f   : > { %2412 = vmatmul.mubr.msk.f32.gmra.mxu0 %vm320_vm1, %v2889_v60  ;;  %v678_v15 = vsel %vm675_vm2, %v676_v63, %v677_v6  ;;  %v680_v23 = vsel %vm675_vm2, %v677_v6, %v679_v9  ;;  %v686_v25 = vrot.slane %v2814_v33, 2  ;;  %v687_v30 = vrot.slane %v2817_v34, 2 }
  0x20   : > { %2424 = vmatmul.mubr.msk.f32.gmra.mxu1 %vm320_vm1, %v2899_v0  ;;  %2414 = vmatprep.mubr.msk.f32.mxu0 %vm320_vm1, %v2902_v1  ;;  %v2946_v37 = vsel %vm675_vm2, %v681_v10, %v682_v16  ;;  %v689_v38 = vrot.slane %v2834_v41, 2  ;;  %v691_v40 = vrot.slane %v2852_v47, 2  ;;  %v1081_v45 = vrot.slane %v2930_v18, 1 }
  0x21   : > { %2426 = vmatprep.mubr.msk.f32.mxu1 %vm320_vm1, %v2907_v7  ;;  %v1253_v51 = vrot.slane %v2930_v18, 2  ;;  %v1082_v52 = vrot.slane %v2940_v31, 1  ;;  %v1084_v41 = vrot.slane %v248_v32, 1  ;;  %v2968_v57 = vsel %vm675_vm2, %v682_v16, %v684_v24 }
  0x22   : > { %v2971_v58 = vsel %vm675_vm2, %v686_v25, %v687_v30  ;;  %v1254_v63 = vrot.slane %v2940_v31, 2  ;;  %v1595_v2 = vrot.slane %v2957_v50, 1  ;;  %v1767_v6 = vrot.slane %v2957_v50, 2 }
  0x23   : > { %2415 = vmatmul.mubr.msk.f32.gmra.mxu0 %vm320_vm1, %v2917_v11  ;;  %v1256_v9 = vrot.slane %v248_v32, 2  ;;  %v3004_v24 = vsel %vm675_vm2, %v687_v30, %v689_v38  ;;  %v1770_v32 = vrot.slane %v251_v56, 2 }
  0x24   : > { %2427 = vmatmul.mubr.msk.f32.gmra.mxu1 %vm320_vm1, %v2922_v12  ;;  %2457 = vmatprep.mubr.msk.f32.mxu0 %vm320_vm1, %v678_v15  ;;  %v2991_v15 = vld [vmem:[%s2741_s25 + $0xe0] sm:$0xff] }
  0x25   : > { %2431 = vmatprep.mubr.msk.f32.mxu1 %vm320_vm1, %v2744_v3  ;;  %v692_v3 = vrot.slane %v2855_v48, 2  ;;  %v1596_v10 = vrot.slane %v2991_v15, 1  ;;  %v1768_v16 = vrot.slane %v2991_v15, 2  ;;  %v3008_v25 = vsel %vm675_vm2, %v1254_v63, %v1256_v9 }
  0x26   : > { %v702_v9 = vrot.slane %v2779_v20, 2 }
  0x27   : > { %2458 = vmatmul.mubr.msk.f32.vlgmr.msra.gmra.mxu0 %vm320_vm1, %v680_v23  ;;  %v1598_v23 = vrot.slane %v251_v56, 1  ;;  %v3019_v30 = vsel %vm675_vm2, %v1767_v6, %v1768_v16  ;;  %v697_v56 = vrot.slane %v2755_v8, 2  ;;  %v701_v6 = vrot.slane %v2776_v19, 2 }
  0x28   : > { %2432 = vmatmul.mubr.msk.f32.vlgmr.msra.gmra.mxu1 %vm320_vm1, %v2747_v4  ;;  %2508 = vmatpush3.msra.mxu0 %v2802_v28  ;;  %v2984_v4 = vsel %vm277_vm0, %v1081_v45, %v1082_v52  ;;  %v2987_v28 = vsel %vm277_vm0, %v1082_v52, %v1084_v41  ;;  %v694_v45 = vrot.slane %v2881_v59, 2  ;;  %v3027_v52 = vsel %vm675_vm2, %v691_v40, %v692_v3 }
  0x29   : > { %2482 = vmatpush3.msra.mxu1 %v2784_v21  ;;  %2434 = vmatprep.mubr.msk.f32.mxu1 %vm320_vm1, %v2767_v14  ;;  %v2997_v21 = vsel %vm675_vm2, %v1253_v51, %v1254_v63  ;;  %v3016_v51 = vsel %vm277_vm0, %v1595_v2, %v1596_v10  ;;  %v3022_v38 = vsel %vm277_vm0, %v1596_v10, %v1598_v23  ;;  %v696_v41 = vrot.slane %v2750_v5, 2 }
  0x2a   : > { %2460 = vmatprep.mubr.msk.f32.mxu0 %vm320_vm1, %v2946_v37  ;;  %2533 = vmatprep.subr.mxu1 %v2953_v26  ;;  %v3032_v59 = vsel %vm675_vm2, %v1768_v16, %v1770_v32  ;;  %v3041_v63 = vsel %vm675_vm2, %v692_v3, %v694_v45  ;;  %v699_v40 = vrot.slane %v2764_v13, 2  ;;  %v704_v3 = vrot.slane %v2797_v27, 2 }
  0x2b   : > { %2461 = vmatmul.mubr.msk.f32.gmra.mxu0 %vm320_vm1, %v2968_v57  ;;  %2559 = vmatprep.subr.mxu0 %v2976_v61  ;;  %v3047_v2 = vsel %vm675_vm2, %v696_v41, %v697_v56  ;;  %v3064_v10 = vsel %vm675_vm2, %v701_v6, %v702_v9  ;;  %v706_v16 = vrot.slane %v2820_v35, 2  ;;  %v707_v23 = vrot.slane %v2830_v39, 2 }
  0x2c   : > { %2435 = vmatmul.mubr.msk.f32.gmra.mxu1 %vm320_vm1, %v2772_v17  ;;  %2463 = vmatprep.mubr.msk.f32.mxu0 %vm320_vm1, %v2971_v58  ;;  %v3058_v13 = vsel %vm675_vm2, %v697_v56, %v699_v40  ;;  %v3075_v27 = vsel %vm675_vm2, %v702_v9, %v704_v3  ;;  %v709_v32 = vrot.slane %v2849_v46, 2  ;;  %v711_v41 = vrot.slane %v2866_v53, 2  ;;  %v2229_v3 = vld [vmem:[%s3576_s1 + $0x40] sm:$0xff] }
  0x2d   : > { %2437 = vmatprep.mubr.msk.f32.mxu1 %vm320_vm1, %v2814_v33  ;;  %v3081_v45 = vsel %vm675_vm2, %v706_v16, %v707_v23  ;;  %v712_v56 = vrot.slane %v2869_v54, 2  ;;  %v714_v40 = vrot.slane %v2893_v62, 2  ;;  %v2212_v62 = vld [vmem:[%s3576_s1 + $0x38] sm:$0xff] }
  0x2e   : > { %v3092_v46 = vsel %vm675_vm2, %v707_v23, %v709_v32 }
  0x2f   : > { %2464 = vmatmul.mubr.msk.f32.gmra.mxu0 %vm320_vm1, %v3004_v24  ;;  %v3098_v6 = vsel %vm675_vm2, %v711_v41, %v712_v56  ;;  %v3107_v9 = vsel %vm675_vm2, %v712_v56, %v714_v40 }
  0x30   : > { %2438 = vmatmul.mubr.msk.f32.gmra.mxu1 %vm320_vm1, %v2817_v34  ;;  %2466 = vmatprep.mubr.msk.f32.mxu0 %vm320_vm1, %v3027_v52 }
  0x31   : > { %2440 = vmatprep.mubr.msk.f32.mxu1 %vm320_vm1, %v2852_v47 }
  0x33   : > { %2467 = vmatmul.mubr.msk.f32.gmra.mxu0 %vm320_vm1, %v3041_v63 }
  0x34   : > { %2441 = vmatmul.mubr.msk.f32.gmra.mxu1 %vm320_vm1, %v2855_v48  ;;  %2469 = vmatprep.mubr.msk.f32.mxu0 %vm320_vm1, %v3047_v2 }
  0x35   : > { %2443 = vmatprep.mubr.msk.f32.mxu1 %vm320_vm1, %v2750_v5 }
  0x37   : > { %2470 = vmatmul.mubr.msk.f32.gmra.mxu0 %vm320_vm1, %v3058_v13 }
  0x38   : > { %2444 = vmatmul.mubr.msk.f32.gmra.mxu1 %vm320_vm1, %v2755_v8  ;;  %2472 = vmatprep.mubr.msk.f32.mxu0 %vm320_vm1, %v3064_v10 }
  0x39   : > { %2446 = vmatprep.mubr.msk.f32.mxu1 %vm320_vm1, %v2776_v19 }
  0x3b   : > { %2473 = vmatmul.mubr.msk.f32.gmra.mxu0 %vm320_vm1, %v3075_v27 }
  0x3c   : > { %2447 = vmatmul.mubr.msk.f32.gmra.mxu1 %vm320_vm1, %v2779_v20  ;;  %2475 = vmatprep.mubr.msk.f32.mxu0 %vm320_vm1, %v3081_v45 }
  0x3d   : > { %2449 = vmatprep.mubr.msk.f32.mxu1 %vm320_vm1, %v2820_v35 }
  0x3f   : > { %2476 = vmatmul.mubr.msk.f32.gmra.mxu0 %vm320_vm1, %v3092_v46 }
  0x40   : > { %2450 = vmatmul.mubr.msk.f32.gmra.mxu1 %vm320_vm1, %v2830_v39  ;;  %2478 = vmatprep.mubr.msk.f32.mxu0 %vm320_vm1, %v3098_v6 }
  0x41   : > { %2452 = vmatprep.mubr.msk.f32.mxu1 %vm320_vm1, %v2866_v53 }
  0x43   : > { %2479 = vmatmul.mubr.msk.f32.gmra.mxu0 %vm320_vm1, %v3107_v9 }
  0x44   : > { %2453 = vmatmul.mubr.msk.f32.gmra.mxu1 %vm320_vm1, %v2869_v54  ;;  %2509 = vmatprep.mubr.msk.f32.mxu0 %vm320_vm1, %v2825_v36 }
  0x45   : > { %2483 = vmatprep.mubr.msk.f32.mxu1 %vm320_vm1, %v2767_v14 }
  0x47   : > { %2510 = vmatmul.mubr.msk.f32.vlgmr.msra.gmra.mxu0 %vm320_vm1, %v2842_v43 }
  0x48   : > { %2484 = vmatmul.mubr.msk.f32.vlgmr.msra.gmra.mxu1 %vm320_vm1, %v2772_v17  ;;  %2560 = vmatpush3.msra.mxu0 %v2976_v61 }
  0x49   : > { %2534 = vmatpush3.msra.mxu1 %v2953_v26  ;;  %2486 = vmatprep.mubr.msk.f32.mxu1 %vm320_vm1, %v2814_v33 }
  0x4a   : > { %2512 = vmatprep.mubr.msk.f32.mxu0 %vm320_vm1, %v2860_v49  ;;  %2585 = vmatprep.subr.mxu1 %v2212_v62 }
  0x4b   : > { %2513 = vmatmul.mubr.msk.f32.gmra.mxu0 %vm320_vm1, %v2889_v60  ;;  %2611 = vmatprep.subr.mxu0 %v2229_v3 }
  0x4c   : > { %2487 = vmatmul.mubr.msk.f32.gmra.mxu1 %vm320_vm1, %v2817_v34  ;;  %2515 = vmatprep.mubr.msk.f32.mxu0 %vm320_vm1, %v2902_v1 }
  0x4d   : > { %2489 = vmatprep.mubr.msk.f32.mxu1 %vm320_vm1, %v2852_v47 }
  0x4f   : > { %2516 = vmatmul.mubr.msk.f32.gmra.mxu0 %vm320_vm1, %v2917_v11 }
  0x50   : > { %2490 = vmatmul.mubr.msk.f32.gmra.mxu1 %vm320_vm1, %v2855_v48  ;;  %2518 = vmatprep.mubr.msk.f32.mxu0 %vm320_vm1, %v2788_v22 }
  0x51   : > { %2492 = vmatprep.mubr.msk.f32.mxu1 %vm320_vm1, %v2750_v5 }
  0x53   : > { %2519 = vmatmul.mubr.msk.f32.gmra.mxu0 %vm320_vm1, %v2808_v29 }
  0x54   : > { %2493 = vmatmul.mubr.msk.f32.gmra.mxu1 %vm320_vm1, %v2755_v8  ;;  %2521 = vmatprep.mubr.msk.f32.mxu0 %vm320_vm1, %v2839_v42 }
  0x55   : > { %2495 = vmatprep.mubr.msk.f32.mxu1 %vm320_vm1, %v2776_v19 }
  0x57   : > { %2522 = vmatmul.mubr.msk.f32.gmra.mxu0 %vm320_vm1, %v2845_v44 }
  0x58   : > { %2496 = vmatmul.mubr.msk.f32.gmra.mxu1 %vm320_vm1, %v2779_v20  ;;  %2524 = vmatprep.mubr.msk.f32.mxu0 %vm320_vm1, %v2875_v55 }
  0x59   : > { %2498 = vmatprep.mubr.msk.f32.mxu1 %vm320_vm1, %v2820_v35 }
  0x5b   : > { %2525 = vmatmul.mubr.msk.f32.gmra.mxu0 %vm320_vm1, %v2899_v0 }
  0x5c   : > { %2499 = vmatmul.mubr.msk.f32.gmra.mxu1 %vm320_vm1, %v2830_v39  ;;  %2527 = vmatprep.mubr.msk.f32.mxu0 %vm320_vm1, %v2907_v7 }
  0x5d   : > { %2501 = vmatprep.mubr.msk.f32.mxu1 %vm320_vm1, %v2866_v53 }
  0x5f   : > { %2528 = vmatmul.mubr.msk.f32.gmra.mxu0 %vm320_vm1, %v2922_v12 }
  0x60   : > { %2502 = vmatmul.mubr.msk.f32.gmra.mxu1 %vm320_vm1, %v2869_v54  ;;  %2530 = vmatprep.mubr.msk.f32.mxu0 %vm320_vm1, %v2984_v4 }
  0x61   : > { %2504 = vmatprep.mubr.msk.f32.mxu1 %vm320_vm1, %v2930_v18 }
  0x63   : > { %2531 = vmatmul.mubr.msk.f32.gmra.mxu0 %vm320_vm1, %v2987_v28 }
  0x64   : > { %2505 = vmatmul.mubr.msk.f32.gmra.mxu1 %vm320_vm1, %v2940_v31  ;;  %2561 = vmatprep.mubr.msk.f32.mxu0 %vm320_vm1, %v2814_v33 }
  0x65   : > { %2535 = vmatprep.mubr.msk.f32.mxu1 %vm320_vm1, %v2946_v37 }
  0x67   : > { %2562 = vmatmul.mubr.msk.f32.vlgmr.msra.gmra.mxu0 %vm320_vm1, %v2817_v34 }
  0x68   : > { %2536 = vmatmul.mubr.msk.f32.vlgmr.msra.gmra.mxu1 %vm320_vm1, %v2968_v57  ;;  %2612 = vmatpush3.msra.mxu0 %v2229_v3 }
  0x69   : > { %2586 = vmatpush3.msra.mxu1 %v2212_v62  ;;  %2538 = vmatprep.mubr.msk.f32.mxu1 %vm320_vm1, %v2971_v58 }
  0x6a   : > { %2564 = vmatprep.mubr.msk.f32.mxu0 %vm320_vm1, %v2852_v47 }
  0x6b   : > { %2565 = vmatmul.mubr.msk.f32.gmra.mxu0 %vm320_vm1, %v2855_v48 }
  0x6c   : > { %2539 = vmatmul.mubr.msk.f32.gmra.mxu1 %vm320_vm1, %v3004_v24  ;;  %2567 = vmatprep.mubr.msk.f32.mxu0 %vm320_vm1, %v2750_v5 }
  0x6d   : > { %2541 = vmatprep.mubr.msk.f32.mxu1 %vm320_vm1, %v3027_v52 }
  0x6f   : > { %2568 = vmatmul.mubr.msk.f32.gmra.mxu0 %vm320_vm1, %v2755_v8 }
  0x70   : > { %2542 = vmatmul.mubr.msk.f32.gmra.mxu1 %vm320_vm1, %v3041_v63  ;;  %2570 = vmatprep.mubr.msk.f32.mxu0 %vm320_vm1, %v2776_v19 }
  0x71   : > { %2544 = vmatprep.mubr.msk.f32.mxu1 %vm320_vm1, %v3047_v2 }
  0x73   : > { %2571 = vmatmul.mubr.msk.f32.gmra.mxu0 %vm320_vm1, %v2779_v20 }
  0x74   : > { %2545 = vmatmul.mubr.msk.f32.gmra.mxu1 %vm320_vm1, %v3058_v13  ;;  %2573 = vmatprep.mubr.msk.f32.mxu0 %vm320_vm1, %v2820_v35 }
  0x75   : > { %2547 = vmatprep.mubr.msk.f32.mxu1 %vm320_vm1, %v3064_v10 }
  0x77   : > { %2574 = vmatmul.mubr.msk.f32.gmra.mxu0 %vm320_vm1, %v2830_v39 }
  0x78   : > { %2548 = vmatmul.mubr.msk.f32.gmra.mxu1 %vm320_vm1, %v3075_v27  ;;  %2576 = vmatprep.mubr.msk.f32.mxu0 %vm320_vm1, %v2866_v53 }
  0x79   : > { %2550 = vmatprep.mubr.msk.f32.mxu1 %vm320_vm1, %v3081_v45 }
  0x7b   : > { %2577 = vmatmul.mubr.msk.f32.gmra.mxu0 %vm320_vm1, %v2869_v54 }
  0x7c   : > { %2551 = vmatmul.mubr.msk.f32.gmra.mxu1 %vm320_vm1, %v3092_v46  ;;  %2579 = vmatprep.mubr.msk.f32.mxu0 %vm320_vm1, %v2930_v18 }
  0x7d   : > { %2553 = vmatprep.mubr.msk.f32.mxu1 %vm320_vm1, %v3098_v6 }
  0x7f   : > { %2580 = vmatmul.mubr.msk.f32.gmra.mxu0 %vm320_vm1, %v2940_v31 }
  0x80   : > { %2554 = vmatmul.mubr.msk.f32.gmra.mxu1 %vm320_vm1, %v3107_v9  ;;  %2582 = vmatprep.mubr.msk.f32.mxu0 %vm320_vm1, %v2957_v50 }
  0x81   : > { %2556 = vmatprep.mubr.msk.f32.mxu1 %vm320_vm1, %v2997_v21 }
  0x83   : > { %2583 = vmatmul.mubr.msk.f32.gmra.mxu0 %vm320_vm1, %v2991_v15 }
  0x84   : > { %2557 = vmatmul.mubr.msk.f32.gmra.mxu1 %vm320_vm1, %v3008_v25  ;;  %2613 = vmatprep.mubr.msk.f32.mxu0 %vm320_vm1, %v2971_v58 }
  0x85   : > { %2587 = vmatprep.mubr.msk.f32.mxu1 %vm320_vm1, %v2860_v49 }
  0x87   : > { %2614 = vmatmul.mubr.msk.f32.vlgmr.msra.gmra.mxu0 %vm320_vm1, %v3004_v24 }
  0x88   : > { %2588 = vmatmul.mubr.msk.f32.vlgmr.msra.gmra.mxu1 %vm320_vm1, %v2889_v60  ;;  %2616 = vmatprep.mubr.msk.f32.mxu0 %vm320_vm1, %v3027_v52 }
  0x89   : > { %2590 = vmatprep.mubr.msk.f32.mxu1 %vm320_vm1, %v2902_v1 }
  0x8b   : > { %2617 = vmatmul.mubr.msk.f32.gmra.mxu0 %vm320_vm1, %v3041_v63 }
  0x8c   : > { %2591 = vmatmul.mubr.msk.f32.gmra.mxu1 %vm320_vm1, %v2917_v11  ;;  %2619 = vmatprep.mubr.msk.f32.mxu0 %vm320_vm1, %v3047_v2 }
  0x8d   : > { %2593 = vmatprep.mubr.msk.f32.mxu1 %vm320_vm1, %v2788_v22 }
  0x8f   : > { %2620 = vmatmul.mubr.msk.f32.gmra.mxu0 %vm320_vm1, %v3058_v13 }
  0x90   : > { %2594 = vmatmul.mubr.msk.f32.gmra.mxu1 %vm320_vm1, %v2808_v29  ;;  %2622 = vmatprep.mubr.msk.f32.mxu0 %vm320_vm1, %v3064_v10 }
  0x91   : > { %2596 = vmatprep.mubr.msk.f32.mxu1 %vm320_vm1, %v2839_v42 }
  0x93   : > { %2623 = vmatmul.mubr.msk.f32.gmra.mxu0 %vm320_vm1, %v3075_v27 }
  0x94   : > { %2597 = vmatmul.mubr.msk.f32.gmra.mxu1 %vm320_vm1, %v2845_v44  ;;  %2625 = vmatprep.mubr.msk.f32.mxu0 %vm320_vm1, %v3081_v45 }
  0x95   : > { %2599 = vmatprep.mubr.msk.f32.mxu1 %vm320_vm1, %v2875_v55 }
  0x97   : > { %2626 = vmatmul.mubr.msk.f32.gmra.mxu0 %vm320_vm1, %v3092_v46 }
  0x98   : > { %2600 = vmatmul.mubr.msk.f32.gmra.mxu1 %vm320_vm1, %v2899_v0  ;;  %2628 = vmatprep.mubr.msk.f32.mxu0 %vm320_vm1, %v3098_v6 }
  0x99   : > { %2602 = vmatprep.mubr.msk.f32.mxu1 %vm320_vm1, %v2907_v7 }
  0x9b   : > { %2629 = vmatmul.mubr.msk.f32.gmra.mxu0 %vm320_vm1, %v3107_v9 }
  0x9c   : > { %2603 = vmatmul.mubr.msk.f32.gmra.mxu1 %vm320_vm1, %v2922_v12  ;;  %2631 = vmatprep.mubr.msk.f32.mxu0 %vm320_vm1, %v2997_v21 }
  0x9d   : > { %2605 = vmatprep.mubr.msk.f32.mxu1 %vm320_vm1, %v2984_v4 }
  0x9f   : > { %2632 = vmatmul.mubr.msk.f32.gmra.mxu0 %vm320_vm1, %v3008_v25 }
  0xa0   : > { %2606 = vmatmul.mubr.msk.f32.gmra.mxu1 %vm320_vm1, %v2987_v28  ;;  %2634 = vmatprep.mubr.msk.f32.mxu0 %vm320_vm1, %v3019_v30 }
  0xa1   : > { %2608 = vmatprep.mubr.msk.f32.mxu1 %vm320_vm1, %v3016_v51 }
  0xa3   : > { %2635 = vmatmul.mubr.msk.f32.gmra.mxu0 %vm320_vm1, %v3032_v59 }
  0xa4   : > { %2609 = vmatmul.mubr.msk.f32.gmra.mxu1 %vm320_vm1, %v3022_v38 }
  0xd7   : > { %v2407_v5 = vpop.f32.mrf.mxu0 }
  0xd8   : > { %v2419_v8 = vpop.f32.mrf.mxu1 }
  0xd9   : > { %v419_v14 = vpop.f32.mrf.mxu0 }
  0xda   : > { %v459_v17 = vpop.f32.mrf.mxu1 }
  0xdb   : > { %v2410_v19 = vpop.f32.mrf.mxu0 }
  0xdc   : > { %v2422_v20 = vpop.f32.mrf.mxu1 }
  0xdd   : > { %v429_v22 = vpop.f32.mrf.mxu0 }
  0xde   : > { %v469_v29 = vpop.f32.mrf.mxu1 }
  0xdf   : > { %v2413_v33 = vpop.f32.mrf.mxu0 }
  0xe0   : > { %v2425_v34 = vpop.f32.mrf.mxu1 }
  0xe1   : > { %v439_v35 = vpop.f32.mrf.mxu0 }
  0xe2   : > { %v479_v36 = vpop.f32.mrf.mxu1 }
  0xe3   : > { %v2416_v39 = vpop.f32.mrf.mxu0 }
  0xe4   : > { %v2428_v42 = vpop.f32.mrf.mxu1 }
  0xe5   : > { %v449_v43 = vpop.f32.mrf.mxu0 }
  0xe6   : > { %v3315_v44 = vpop.f32.mrf.mxu1 }
  0xe7   : > { %v2459_v47 = vpop.f32.mrf.mxu0 }
  0xe8   : > { %v2433_v48 = vpop.f32.mrf.mxu1 }
  0xe9   : > { %v602_v49 = vadd.f32 %v2433_v48, %v2407_v5  ;;  %v816_v53 = vpop.f32.mrf.mxu0 }
  0xea   : > { %v596_v54 = vpop.f32.mrf.mxu1 }
  0xeb   : > { %v3317_v55 = vadd.f32 %v2459_v47, %v602_v49  ;;  %v597_v60 = vadd.f32 %v596_v54, %v419_v14  ;;  %v2462_v0 = vpop.f32.mrf.mxu0 }
  0xec   : > { %v2436_v1 = vpop.f32.mrf.mxu1 }
  0xed   : > { %v3319_v7 = vadd.f32 %v816_v53, %v597_v60  ;;  %v612_v11 = vadd.f32 %v2436_v1, %v2410_v19  ;;  %v826_v12 = vpop.f32.mrf.mxu0 }
  0xee   : > { %v606_v18 = vpop.f32.mrf.mxu1 }
  0xef   : > { %v3321_v31 = vadd.f32 %v2462_v0, %v612_v11  ;;  %v607_v37 = vadd.f32 %v606_v18, %v429_v22  ;;  %v2465_v26 = vpop.f32.mrf.mxu0 }
  0xf0   : > { %v2439_v50 = vpop.f32.mrf.mxu1 }
  0xf1   : > { %v3323_v57 = vadd.f32 %v826_v12, %v607_v37  ;;  %v622_v58 = vadd.f32 %v2439_v50, %v2413_v33  ;;  %v836_v61 = vpop.f32.mrf.mxu0 }
  0xf2   : > { %v616_v4 = vpop.f32.mrf.mxu1 }
  0xf3   : > { %v3325_v28 = vadd.f32 %v2465_v26, %v622_v58  ;;  %v617_v15 = vadd.f32 %v616_v4, %v439_v35  ;;  %v2468_v21 = vpop.f32.mrf.mxu0 }
  0xf4   : > { %v2442_v24 = vpop.f32.mrf.mxu1 }
  0xf5   : > { %v3327_v25 = vadd.f32 %v836_v61, %v617_v15  ;;  %v632_v51 = vadd.f32 %v2442_v24, %v2416_v39  ;;  %v846_v30 = vpop.f32.mrf.mxu0 }
  0xf6   : > { %v626_v38 = vpop.f32.mrf.mxu1 }
  0xf7   : > { %v3329_v52 = vadd.f32 %v2468_v21, %v632_v51  ;;  %v627_v59 = vadd.f32 %v626_v38, %v449_v43  ;;  %v2471_v63 = vpop.f32.mrf.mxu0 }
  0xf8   : > { %v2445_v2 = vpop.f32.mrf.mxu1 }
  0xf9   : > { %v3331_v13 = vadd.f32 %v846_v30, %v627_v59  ;;  %v642_v10 = vadd.f32 %v2445_v2, %v2419_v8  ;;  %v856_v16 = vpop.f32.mrf.mxu0 }
  0xfa   : > { %v636_v23 = vpop.f32.mrf.mxu1 }
  0xfb   : > { %v3333_v27 = vadd.f32 %v2471_v63, %v642_v10  ;;  %v637_v32 = vadd.f32 %v636_v23, %v459_v17  ;;  %v2474_v45 = vpop.f32.mrf.mxu0 }
  0xfc   : > { %v2448_v41 = vpop.f32.mrf.mxu1 }
  0xfd   : > { %v3335_v56 = vadd.f32 %v856_v16, %v637_v32  ;;  %v652_v46 = vadd.f32 %v2448_v41, %v2422_v20  ;;  %v866_v40 = vpop.f32.mrf.mxu0 }
  0xfe   : > { %v646_v6 = vpop.f32.mrf.mxu1 }
  0xff   : > { %v3337_v9 = vadd.f32 %v2474_v45, %v652_v46  ;;  %v647_v62 = vadd.f32 %v646_v6, %v469_v29  ;;  %v2477_v3 = vpop.f32.mrf.mxu0 }
 0x100   : > { %v2451_v5 = vpop.f32.mrf.mxu1 }
 0x101   : > { %v3339_v14 = vadd.f32 %v866_v40, %v647_v62  ;;  %v662_v8 = vadd.f32 %v2451_v5, %v2425_v34  ;;  %v876_v19 = vpop.f32.mrf.mxu0 }
 0x102   : > { %v656_v22 = vpop.f32.mrf.mxu1 }
 0x103   : > { %v3341_v33 = vadd.f32 %v2477_v3, %v662_v8  ;;  %v657_v17 = vadd.f32 %v656_v22, %v479_v36  ;;  %v2480_v35 = vpop.f32.mrf.mxu0 }
 0x104   : > { %v2454_v39 = vpop.f32.mrf.mxu1 }
 0x105   : > { %v3343_v43 = vadd.f32 %v876_v19, %v657_v17  ;;  %v672_v20 = vadd.f32 %v2454_v39, %v2428_v42  ;;  %v886_v47 = vpop.f32.mrf.mxu0 }
 0x106   : > { %v666_v48 = vpop.f32.mrf.mxu1 }
 0x107   : > { %3579 = vst [vmem:[#allocation2_spill] sm:$0xff] %v3343_v43  ;;  %v3345_v49 = vadd.f32 %v2480_v35, %v672_v20  ;;  %v667_v29 = vadd.f32 %v666_v48, %v3315_v44  ;;  %v2511_v53 = vpop.f32.mrf.mxu0 }
 0x108   : > { %v2485_v54 = vpop.f32.mrf.mxu1 }
 0x109   : > { %3580 = vst [vmem:[#allocation3_spill] sm:$0xff] %v3345_v49  ;;  %v3348_v60 = vadd.f32 %v886_v47, %v667_v29  ;;  %v1158_v34 = vpop.f32.mrf.mxu0  ;;  %v1065_v49 = vadd.f32 %v2485_v54, %v3317_v55 }
 0x10a   : > { %v985_v0 = vpop.f32.mrf.mxu1 }
 0x10b   : > { %3581 = vst [vmem:[#allocation4_spill] sm:$0xff] %v3348_v60  ;;  %v3350_v1 = vpop.f32.mrf.mxu0  ;;  %v1064_v43 = vadd.f32 %v985_v0, %v3319_v7 }
 0x10c   : > { %v2488_v36 = vpop.f32.mrf.mxu1 }
 0x10d   : > { %v3352_v11 = vpop.f32.mrf.mxu0 }
 0x10e   : > { %v995_v12 = vpop.f32.mrf.mxu1 }
 0x10f   : > { %v3354_v18 = vpop.f32.mrf.mxu0  ;;  %v1066_v55 = vadd.f32 %v995_v12, %v3323_v57 }
 0x110   : > { %v2491_v42 = vpop.f32.mrf.mxu1 }
 0x111   : > { %v3356_v37 = vpop.f32.mrf.mxu0 }
 0x112   : > { %v1005_v26 = vpop.f32.mrf.mxu1 }
 0x113   : > { %v3358_v50 = vpop.f32.mrf.mxu0 }
 0x114   : > { %v3360_v44 = vpop.f32.mrf.mxu1 }
 0x115   : > { %v3362_v58 = vpop.f32.mrf.mxu0 }
 0x116   : > { %v3364_v61 = vpop.f32.mrf.mxu1 }
 0x117   : > { %v3366_v4 = vpop.f32.mrf.mxu0 }
 0x118   : > { %v3368_v15 = vpop.f32.mrf.mxu1 }
 0x119   : > { %v3370_v21 = vpop.f32.mrf.mxu0 }
 0x11a   : > { %v3372_v24 = vpop.f32.mrf.mxu1 }
 0x11b   : > { %v3374_v51 = vpop.f32.mrf.mxu0 }
 0x11c   : > { %v3376_v30 = vpop.f32.mrf.mxu1 }
 0x11d   : > { %v3378_v38 = vpop.f32.mrf.mxu0 }
 0x11e   : > { %3582 = vst [vmem:[#allocation5_spill] sm:$0xff] %v3378_v38  ;;  %v3380_v59 = vpop.f32.mrf.mxu1 }
 0x11f   : > { %v3382_v63 = vpop.f32.mrf.mxu0 }
 0x120   : > { %3583 = vst [vmem:[#allocation6_spill] sm:$0xff] %v3382_v63  ;;  %v3384_v2 = vpop.f32.mrf.mxu1 }
 0x121   : > { %v3386_v10 = vpop.f32.mrf.mxu0 }
 0x122   : > { %3584 = vst [vmem:[#allocation7_spill] sm:$0xff] %v3386_v10  ;;  %v3388_v16 = vpop.f32.mrf.mxu1 }
 0x123   : > { %3585 = vst [vmem:[#allocation8_spill] sm:$0xff] %v3388_v16  ;;  %v3390_v23 = vpop.f32.mrf.mxu0 }
 0x124   : > { %3586 = vst [vmem:[#allocation9_spill] sm:$0xff] %v3390_v23  ;;  %v3392_v32 = vpop.f32.mrf.mxu1 }
 0x125   : > { %3587 = vst [vmem:[#allocation10_spill] sm:$0xff] %v3392_v32  ;;  %v3394_v45 = vpop.f32.mrf.mxu0 }
 0x126   : > { %3588 = vst [vmem:[#allocation11_spill] sm:$0xff] %v3394_v45  ;;  %v3396_v41 = vpop.f32.mrf.mxu1 }
 0x127   : > { %3589 = vst [vmem:[#allocation12_spill] sm:$0xff] %v3396_v41  ;;  %v2563_v46 = vpop.f32.mrf.mxu0 }
 0x128   : > { %v2537_v40 = vpop.f32.mrf.mxu1 }
 0x129   : > { %v1499_v6 = vpop.f32.mrf.mxu0 }
 0x12a   : > { %v1330_v62 = vpop.f32.mrf.mxu1 }
 0x12b   : > { %v2566_v3 = vpop.f32.mrf.mxu0 }
 0x12c   : > { %v2540_v5 = vpop.f32.mrf.mxu1 }
 0x12d   : > { %v3398_v8 = vpop.f32.mrf.mxu0 }
 0x12e   : > { %v1340_v19 = vpop.f32.mrf.mxu1 }
 0x12f   : > { %v3400_v22 = vpop.f32.mrf.mxu0 }
 0x130   : > { %v2543_v17 = vpop.f32.mrf.mxu1 }
 0x131   : > { %v3402_v35 = vpop.f32.mrf.mxu0 }
 0x132   : > { %v1350_v39 = vpop.f32.mrf.mxu1 }
 0x133   : > { %v3404_v20 = vpop.f32.mrf.mxu0 }
 0x134   : > { %v3406_v47 = vpop.f32.mrf.mxu1 }
 0x135   : > { %v3408_v48 = vpop.f32.mrf.mxu0 }
 0x136   : > { %3590 = vst [vmem:[#allocation13_spill] sm:$0xff] %v3408_v48  ;;  %v3410_v29 = vpop.f32.mrf.mxu1  ;;  %v1238_v48 = vadd.f32 %v2511_v53, %v1065_v49 }
 0x137   : > { %v3412_v45 = vpop.f32.mrf.mxu0 }
 0x138   : > { %3591 = vst [vmem:[#allocation14_spill] sm:$0xff] %v3412_v45  ;;  %v3414_v23 = vpop.f32.mrf.mxu1  ;;  %v1410_v54 = vadd.f32 %v2537_v40, %v1238_v48 }
 0x139   : > { %v3416_v41 = vpop.f32.mrf.mxu0 }
 0x13a   : > { %3592 = vst [vmem:[#allocation15_spill] sm:$0xff] %v3416_v41  ;;  %v3418_v60 = vpop.f32.mrf.mxu1  ;;  %v1067_v41 = vadd.f32 %v2488_v36, %v3321_v31  ;;  %v1068_v31 = vadd.f32 %v1005_v26, %v3327_v25  ;;  %v1579_v57 = vadd.f32 %v2563_v46, %v1410_v54  ;;  %v1070_v26 = vadd.f32 %v3364_v61, %v3331_v13  ;;  %v3462_v46 = vld [vmem:[%s3577_s2] ss:$0 sm:$0xff] }
 0x13b   : > { %3593 = vst [vmem:[#allocation16_spill] sm:$0xff] %v3418_v60  ;;  %v3420_v10 = vpop.f32.mrf.mxu0 }
 0x13c   : > { %3594 = vst [vmem:[#allocation17_spill] sm:$0xff] %v3420_v10  ;;  %v3422_v32 = vpop.f32.mrf.mxu1  ;;  %v1240_v0 = vadd.f32 %v3350_v1, %v1067_v41  ;;  %v1241_v25 = vadd.f32 %v3356_v37, %v1068_v31 }
 0x13d   : > { %3595 = vst [vmem:[#allocation18_spill] sm:$0xff] %v3422_v32  ;;  %v3425_v63 = vpop.f32.mrf.mxu0  ;;  %v1237_v32 = vadd.f32 %v1158_v34, %v1064_v43  ;;  %v1239_v43 = vadd.f32 %v3352_v11, %v1066_v55 }
 0x13e   : > { %3596 = vst [vmem:[#allocation19_spill] sm:$0xff] %v3425_v63  ;;  %v3427_v16 = vpop.f32.mrf.mxu1  ;;  %v1412_v34 = vadd.f32 %v2540_v5, %v1240_v0  ;;  %v1073_v5 = vadd.f32 %v3368_v15, %v3333_v27  ;;  %v1413_v37 = vadd.f32 %v1350_v39, %v1241_v25  ;;  %v1072_v27 = vadd.f32 %v3372_v24, %v3335_v56 }
 0x13f   : > { %3597 = vst [vmem:[#allocation20_spill] sm:$0xff] %v3427_v16  ;;  %v3430_v38 = vpop.f32.mrf.mxu0  ;;  %v1069_v16 = vadd.f32 %v2491_v42, %v3325_v28  ;;  %v1409_v49 = vadd.f32 %v1330_v62, %v1237_v32  ;;  %v1071_v28 = vadd.f32 %v3360_v44, %v3329_v52  ;;  %v1411_v1 = vadd.f32 %v1340_v19, %v1239_v43 }
 0x140   : > { %v3432_v45 = vpop.f32.mrf.mxu1  ;;  %v1246_v43 = vadd.f32 %v3366_v4, %v1073_v5  ;;  %v1582_v56 = vadd.f32 %v3402_v35, %v1413_v37  ;;  %v1074_v4 = vadd.f32 %v3380_v59, %v3339_v14 }
 0x141   : > { %v3435_v60 = vpop.f32.mrf.mxu0  ;;  %v1242_v40 = vadd.f32 %v3354_v18, %v1069_v16  ;;  %v1578_v48 = vadd.f32 %v1499_v6, %v1409_v49  ;;  %v1581_v16 = vadd.f32 %v2566_v3, %v1412_v34  ;;  %v1244_v62 = vadd.f32 %v3358_v50, %v1071_v28 }
 0x142   : > { %v3437_v10 = vpop.f32.mrf.mxu1  ;;  %v1580_v61 = vadd.f32 %v3398_v8, %v1411_v1  ;;  %v1243_v50 = vadd.f32 %v3362_v58, %v1070_v26  ;;  %v1075_v58 = vadd.f32 %v3376_v30, %v3337_v9  ;;  %v1418_v9 = vadd.f32 %v3414_v23, %v1246_v43  ;;  %v3599_v23 = vld [vmem:[#allocation13_spill] sm:$0xff] }
 0x143   : > { %v3440_v63 = vpop.f32.mrf.mxu0  ;;  %v1414_v11 = vadd.f32 %v2543_v17, %v1242_v40  ;;  %v1416_v54 = vadd.f32 %v3406_v47, %v1244_v62  ;;  %v1245_v40 = vadd.f32 %v3370_v21, %v1072_v27  ;;  %v1077_v21 = vadd.f32 %v3384_v2, %v3341_v33 }
 0x144   : > { %v3443_v7 = vpop.f32.mrf.mxu1  ;;  %v1248_v1 = vadd.f32 %v3374_v51, %v1075_v58  ;;  %v3602_v51 = vld [vmem:[#allocation8_spill] sm:$0xff]  ;;  %v3604_v62 = vld [vmem:[#allocation18_spill] sm:$0xff] }
 0x145   : > { %v3446_v53 = vpop.f32.mrf.mxu0  ;;  %v1583_v15 = vadd.f32 %v3400_v22, %v1414_v11  ;;  %v1415_v22 = vadd.f32 %v3410_v29, %v1243_v50  ;;  %v1585_v35 = vadd.f32 %v3404_v20, %v1416_v54  ;;  %v3607_v50 = vld [vmem:[#allocation10_spill] sm:$0xff] }
 0x146   : > { %v3449_v36 = vpop.f32.mrf.mxu1  ;;  %v1420_v5 = vadd.f32 %v3604_v62, %v1248_v1 }
 0x147   : > { %v2615_v12 = vpop.f32.mrf.mxu0 }
 0x148   : > { %v2589_v42 = vpop.f32.mrf.mxu1 }
 0x149   : > { %v1752_v32 = vadd.f32 %v2589_v42, %v1579_v57  ;;  %v1844_v41 = vpop.f32.mrf.mxu0 }
 0x14a   : > { %v1672_v18 = vpop.f32.mrf.mxu1 }
 0x14b   : > { %v1924_v52 = vadd.f32 %v2615_v12, %v1752_v32  ;;  %v1751_v44 = vadd.f32 %v1672_v18, %v1578_v48  ;;  %v2618_v6 = vpop.f32.mrf.mxu0  ;;  %v3598_v32 = vld [vmem:[#allocation16_spill] sm:$0xff]  ;;  %v3600_v18 = vld [vmem:[#allocation5_spill] sm:$0xff] }
 0x14c   : > { %v2592_v13 = vpop.f32.mrf.mxu1  ;;  %v1417_v14 = vadd.f32 %v3598_v32, %v1245_v40  ;;  %v3613_v40 = vld [vmem:[#allocation17_spill] sm:$0xff] }
 0x14d   : > { %v1947_v3 = vadd.f32 %v3462_v46, %v1924_v52  ;;  %v1923_v19 = vadd.f32 %v1844_v41, %v1751_v44  ;;  %v1754_v17 = vadd.f32 %v2592_v13, %v1581_v16  ;;  %v1854_v55 = vpop.f32.mrf.mxu0  ;;  %v1584_v41 = vadd.f32 %v3599_v23, %v1415_v22  ;;  %v3601_v52 = vld [vmem:[#allocation2_spill] sm:$0xff]  ;;  %v3611_v22 = vld [vmem:[#allocation4_spill] sm:$0xff] }
 0x14e   : > { %v1682_v39 = vpop.f32.mrf.mxu1  ;;  %v1247_v16 = vadd.f32 %v3600_v18, %v1074_v4  ;;  %v1076_v44 = vadd.f32 %v3602_v51, %v3601_v52  ;;  %v1589_v4 = vadd.f32 %v3613_v40, %v1420_v5 }
 0x14f   : > { %1964 = vst.msk [vmem:[%s3470_s19 + $0x8] sm:$0xff] %vm1962_vm3, %v1947_v3  ;;  %v1946_v8 = vadd.f32 %v3462_v46, %v1923_v19  ;;  %v1926_v0 = vadd.f32 %v2618_v6, %v1754_v17  ;;  %v1753_v49 = vadd.f32 %v1682_v39, %v1580_v61  ;;  %v2621_v31 = vpop.f32.mrf.mxu0  ;;  %v3603_v6 = vld [vmem:[#allocation14_spill] sm:$0xff] }
 0x150   : > { %v2595_v24 = vpop.f32.mrf.mxu1  ;;  %v1587_v33 = vadd.f32 %v3603_v6, %v1418_v9  ;;  %v3605_v19 = vld [vmem:[#allocation6_spill] sm:$0xff] }
 0x151   : > { %1963 = vst.msk [vmem:[%s3470_s19] sm:$0xff] %vm1962_vm3, %v1946_v8  ;;  %v1949_v47 = vadd.f32 %v3462_v46, %v1926_v0  ;;  %v1925_v57 = vadd.f32 %v1854_v55, %v1753_v49  ;;  %v1756_v34 = vadd.f32 %v2595_v24, %v1583_v15  ;;  %v1864_v12 = vpop.f32.mrf.mxu0  ;;  %v1250_v17 = vadd.f32 %v3605_v19, %v1077_v21  ;;  %v3606_v55 = vld [vmem:[#allocation3_spill] sm:$0xff]  ;;  %v3609_v8 = vld [vmem:[#allocation20_spill] sm:$0xff] }
 0x152   : > { %v1692_v30 = vpop.f32.mrf.mxu1  ;;  %v1079_v27 = vadd.f32 %v3607_v50, %v3606_v55  ;;  %v3608_v15 = vld [vmem:[#allocation15_spill] sm:$0xff]  ;;  %v1419_v0 = vadd.f32 %v3609_v8, %v1247_v16 }
 0x153   : > { %1966 = vst.msk [vmem:[%s3470_s19 + $0x18] sm:$0xff] %vm1962_vm3, %v1949_v47  ;;  %v1948_v29 = vadd.f32 %v3462_v46, %v1925_v57  ;;  %v1928_v28 = vadd.f32 %v2621_v31, %v1756_v34  ;;  %v1755_v42 = vadd.f32 %v1692_v30, %v1582_v56  ;;  %v2624_v48 = vpop.f32.mrf.mxu0  ;;  %v1586_v39 = vadd.f32 %v3608_v15, %v1417_v14  ;;  %v3610_v56 = vld [vmem:[#allocation7_spill] sm:$0xff]  ;;  %v3612_v47 = vld [vmem:[#allocation12_spill] sm:$0xff] }
 0x154   : > { %v2598_v59 = vpop.f32.mrf.mxu1  ;;  %v1249_v24 = vadd.f32 %v3610_v56, %v1076_v44  ;;  %v1078_v57 = vadd.f32 %v3612_v47, %v3611_v22  ;;  %v1422_v34 = vadd.f32 %v3432_v45, %v1250_v17  ;;  %v3615_v21 = vld [vmem:[#allocation19_spill] sm:$0xff] }
 0x155   : > { %1965 = vst.msk [vmem:[%s3470_s19 + $0x10] sm:$0xff] %vm1962_vm3, %v1948_v29  ;;  %v1951_v20 = vadd.f32 %v3462_v46, %v1928_v28  ;;  %v1927_v25 = vadd.f32 %v1864_v12, %v1755_v42  ;;  %v1758_v26 = vadd.f32 %v2598_v59, %v1585_v35  ;;  %v1874_v11 = vpop.f32.mrf.mxu0  ;;  %v3614_v28 = vld [vmem:[#allocation9_spill] sm:$0xff]  ;;  %v1588_v32 = vadd.f32 %v3615_v21, %v1419_v0 }
 0x156   : > { %v1702_v2 = vpop.f32.mrf.mxu1  ;;  %v1252_v42 = vadd.f32 %v3614_v28, %v1079_v27 }
 0x157   : > { %1968 = vst.msk [vmem:[%s3470_s19 + $0x28] sm:$0xff] %vm1962_vm3, %v1951_v20  ;;  %v1950_v37 = vadd.f32 %v3462_v46, %v1927_v25  ;;  %v1930_v13 = vadd.f32 %v2624_v48, %v1758_v26  ;;  %v1757_v61 = vadd.f32 %v1702_v2, %v1584_v41  ;;  %v2627_v3 = vpop.f32.mrf.mxu0  ;;  %v1421_v48 = vadd.f32 %v3437_v10, %v1249_v24  ;;  %v3616_v41 = vld [vmem:[#allocation11_spill] sm:$0xff] }
 0x158   : > { %v2601_v54 = vpop.f32.mrf.mxu1  ;;  %v1251_v20 = vadd.f32 %v3616_v41, %v1078_v57  ;;  %v1591_v25 = vadd.f32 %v3430_v38, %v1422_v34 }
 0x159   : > { %1967 = vst.msk [vmem:[%s3470_s19 + $0x20] sm:$0xff] %vm1962_vm3, %v1950_v37  ;;  %v1953_v49 = vadd.f32 %v3462_v46, %v1930_v13  ;;  %v1929_v31 = vadd.f32 %v1874_v11, %v1757_v61  ;;  %v1760_v43 = vadd.f32 %v2601_v54, %v1587_v33  ;;  %v1884_v58 = vpop.f32.mrf.mxu0  ;;  %v1424_v11 = vadd.f32 %v3443_v7, %v1252_v42 }
 0x15a   : > { %v1712_v12 = vpop.f32.mrf.mxu1  ;;  %v1590_v51 = vadd.f32 %v3435_v60, %v1421_v48  ;;  %v1423_v6 = vadd.f32 %v3449_v36, %v1251_v20 }
 0x15b   : > { %1970 = vst.msk [vmem:[%s3470_s19 + $0x38] sm:$0xff] %vm1962_vm3, %v1953_v49  ;;  %v1952_v9 = vadd.f32 %v3462_v46, %v1929_v31  ;;  %v1932_v30 = vadd.f32 %v2627_v3, %v1760_v43  ;;  %v1759_v35 = vadd.f32 %v1712_v12, %v1586_v39  ;;  %v2630_v29 = vpop.f32.mrf.mxu0  ;;  %v1593_v5 = vadd.f32 %v3440_v63, %v1424_v11 }
 0x15c   : > { %v2604_v1 = vpop.f32.mrf.mxu1  ;;  %v1592_v3 = vadd.f32 %v3446_v53, %v1423_v6 }
 0x15d   : > { %1969 = vst.msk [vmem:[%s3470_s19 + $0x30] sm:$0xff] %vm1962_vm3, %v1952_v9  ;;  %v1955_v45 = vadd.f32 %v3462_v46, %v1932_v30  ;;  %v1931_v14 = vadd.f32 %v1884_v58, %v1759_v35  ;;  %v1762_v59 = vadd.f32 %v2604_v1, %v1589_v4  ;;  %v1894_v23 = vpop.f32.mrf.mxu0 }
 0x15e   : > { %v1722_v26 = vpop.f32.mrf.mxu1 }
 0x15f   : > { %1972 = vst.msk [vmem:[%s3470_s19 + $0x48] sm:$0xff] %vm1962_vm3, %v1955_v45  ;;  %v1954_v10 = vadd.f32 %v3462_v46, %v1931_v14  ;;  %v1934_v18 = vadd.f32 %v2630_v29, %v1762_v59  ;;  %v1761_v16 = vadd.f32 %v1722_v26, %v1588_v32  ;;  %v2633_v52 = vpop.f32.mrf.mxu0 }
 0x160   : > { %v2607_v44 = vpop.f32.mrf.mxu1 }
 0x161   : > { %1971 = vst.msk [vmem:[%s3470_s19 + $0x40] sm:$0xff] %vm1962_vm3, %v1954_v10  ;;  %v1957_v38 = vadd.f32 %v3462_v46, %v1934_v18  ;;  %v1933_v33 = vadd.f32 %v1894_v23, %v1761_v16  ;;  %v1764_v7 = vadd.f32 %v2607_v44, %v1591_v25  ;;  %v1904_v2 = vpop.f32.mrf.mxu0 }
 0x162   : > { %v1732_v62 = vpop.f32.mrf.mxu1 }
 0x163   : > { %1974 = vst.msk [vmem:[%s3470_s19 + $0x58] sm:$0xff] %vm1962_vm3, %v1957_v38  ;;  %v1956_v37 = vadd.f32 %v3462_v46, %v1933_v33  ;;  %v1936_v60 = vadd.f32 %v2633_v52, %v1764_v7  ;;  %v1763_v13 = vadd.f32 %v1732_v62, %v1590_v51  ;;  %v2636_v36 = vpop.f32.mrf.mxu0 }
 0x164   : > { %v2610_v61 = vpop.f32.mrf.mxu1 }
 0x165   : > { %1973 = vst.msk [vmem:[%s3470_s19 + $0x50] sm:$0xff] %vm1962_vm3, %v1956_v37  ;;  %v1959_v19 = vadd.f32 %v3462_v46, %v1936_v60  ;;  %v1935_v17 = vadd.f32 %v1904_v2, %v1763_v13  ;;  %v1766_v55 = vadd.f32 %v2610_v61, %v1593_v5  ;;  %v1914_v39 = vpop.f32.mrf.mxu0 }
 0x166   : > { %v1742_v63 = vpop.f32.mrf.mxu1 }
 0x167   : > { %1976 = vst.msk [vmem:[%s3470_s19 + $0x68] sm:$0xff] %vm1962_vm3, %v1959_v19  ;;  %v1958_v50 = vadd.f32 %v3462_v46, %v1935_v17  ;;  %v1938_v27 = vadd.f32 %v2636_v36, %v1766_v55  ;;  %v1765_v15 = vadd.f32 %v1742_v63, %v1592_v3 }
 0x169   : > { %1975 = vst.msk [vmem:[%s3470_s19 + $0x60] sm:$0xff] %vm1962_vm3, %v1958_v50  ;;  %v1961_v54 = vadd.f32 %v3462_v46, %v1938_v27  ;;  %v1937_v53 = vadd.f32 %v1914_v39, %v1765_v15 }
 0x16b   : > { %1978 = vst.msk [vmem:[%s3470_s19 + $0x78] sm:$0xff] %vm1962_vm3, %v1961_v54  ;;  %v1960_v8 = vadd.f32 %v3462_v46, %v1937_v53 }
 0x16d   : > { %1977 = vst.msk [vmem:[%s3470_s19 + $0x70] sm:$0xff] %vm1962_vm3, %v1960_v8 }
 0x16e PF: > { %s13_s14 = sadd.s32 1, %s2686_s14   ;;  %s3617_s12 = smov %s2682_s13 }
 0x16f   : > { %p10_p5 = scmp.ge.s32.totalorder %s13_s14, 6   ;;  %s3618_s13 = smov %s3620_s15 }
 0x171   :  { %12 = sbr.rel (!%p10_p5) target bundleno = 2 (0x2), region = 76 }

</bundles_post_ra>
